<compile_context>
chip_gen: v6e
topology: v6e:2x2x1
jax: 0.10.0
libtpu: 0.0.40
codegen_flags: <defaults>
</compile_context>

<pallas_src>
import jax
import jax.numpy as jnp
from jax.experimental import pallas as pl
from jax.experimental.pallas import tpu as pltpu

_LANES = 128
_MAX_ROW_TILE = 4096       # 4096x128 int32 = 2 MiB per buffer; ~9 MiB double-buffered
_SUBLANE_ALIGN = 32        # multiple of 32 rows satisfies int8/bf16/int32 sublane tiling


def _label_kernel(ids_ref, mask_ref, labels_ref):
    # labels = input_ids ; labels[attention_mask == 0] = -100
    # One compare + one select per vreg (VPU); purely HBM-bandwidth bound.
    labels_ref[...] = jnp.where(
        mask_ref[...] == 0,
        jnp.asarray(-100, labels_ref.dtype),
        ids_ref[...],
    )


def _round_down(x: int, m: int) -> int:
    return (x // m) * m


@jax.jit
def text_encode_forward(input_ids: jax.Array, attention_mask: jax.Array):
    """Pallas equivalent of Text_Encode.forward on tokenizer outputs.

    Args:
      input_ids:      signed-int [B, L] token ids (tokenizer output)
      attention_mask: int/bool   [B, L] (1 = token, 0 = padding)

    Returns dict with 'input_ids', 'attention_mask', 'labels',
    'decoder_attention_mask' (the keys Text_Encode adds/returns).
    """
    assert input_ids.shape == attention_mask.shape
    ids_dtype = jnp.dtype(input_ids.dtype)
    # -100 sentinel must survive the cast: require a signed int of <= 32 bits
    # (TPU has no native int64; unsigned would wrap the sentinel).
    if not jnp.issubdtype(ids_dtype, jnp.signedinteger) or ids_dtype.itemsize > 4:
        raise TypeError(
            f"input_ids must be a signed integer dtype of <= 32 bits, got {ids_dtype}")
    out_dtype = ids_dtype

    mask = attention_mask
    if mask.dtype == jnp.bool_:
        mask = mask.astype(jnp.int8)

    B, L = input_ids.shape
    n_elems = B * L
    pad = (-n_elems) % _LANES                     # only pad to a 128-elem boundary

    ids_flat = input_ids.reshape(-1)
    mask_flat = mask.reshape(-1)
    if pad:
        ids_flat = jnp.pad(ids_flat, (0, pad))
        mask_flat = jnp.pad(mask_flat, (0, pad))  # pad mask=0 -> padded labels=-100, sliced off
    n_rows = (n_elems + pad) // _LANES

    ids_2d = ids_flat.reshape(n_rows, _LANES)     # lane-dense view: unmasked full-width vst
    mask_2d = mask_flat.reshape(n_rows, _LANES)

    # Row tile: one block for small payloads; otherwise up to 4096 rows while
    # keeping >= 4 grid steps so v7x's two TensorCores both get work and
    # double-buffering stays alive. Ragged last tile is handled by Pallas.
    if n_rows <= 4 * _SUBLANE_ALIGN:
        row_tile = n_rows                         # block == full array (always legal)
    else:
        quarter = max(_SUBLANE_ALIGN, _round_down(n_rows // 4, _SUBLANE_ALIGN))
        row_tile = min(_MAX_ROW_TILE, quarter)
    grid = (pl.cdiv(n_rows, row_tile),)

    bytes_accessed = (
        ids_2d.size * ids_2d.dtype.itemsize
        + mask_2d.size * mask_2d.dtype.itemsize
        + n_rows * _LANES * out_dtype.itemsize
    )

    labels_2d = pl.pallas_call(
        _label_kernel,
        grid=grid,
        in_specs=[
            pl.BlockSpec((row_tile, _LANES), lambda i: (i, 0)),
            pl.BlockSpec((row_tile, _LANES), lambda i: (i, 0)),
        ],
        out_specs=pl.BlockSpec((row_tile, _LANES), lambda i: (i, 0)),
        out_shape=jax.ShapeDtypeStruct((n_rows, _LANES), out_dtype),
        compiler_params=pltpu.CompilerParams(
            dimension_semantics=("parallel",)),
        cost_estimate=pl.CostEstimate(
            flops=0, transcendentals=0, bytes_accessed=bytes_accessed),
    )(ids_2d, mask_2d)

    if pad:
        labels = labels_2d.reshape(-1)[:n_elems].reshape(B, L)
    else:
        labels = labels_2d.reshape(B, L)

    return {
        "input_ids": input_ids,
        "attention_mask": attention_mask,
        "labels": labels,
        # JAX arrays are immutable: aliasing preserves .clone() semantics and
        # avoids a redundant B*L HBM write.
        "decoder_attention_mask": attention_mask,
    }


def _make_inputs(key, B, L, vocab=32000):
    k_ids, k_len = jax.random.split(key)
    input_ids = jax.random.randint(k_ids, (B, L), 1, vocab, dtype=jnp.int32)
    lengths = jax.random.randint(k_len, (B,), max(1, L // 2), L + 1, dtype=jnp.int32)
    positions = jnp.arange(L, dtype=jnp.int32)[None, :]
    attention_mask = (positions < lengths[:, None]).astype(jnp.int32)
    input_ids = input_ids * attention_mask        # zero padded ids like a real tokenizer
    return input_ids, attention_mask


if __name__ == "__main__":
    key = jax.random.PRNGKey(0)
    k0, k1 = jax.random.split(key)

    # Deterministic synthetic "tokenizer outputs".
    # (1) small ragged case: batch=2, max_input_length=8 (exercises pad path)
    # (2) lane-aligned case: batch=2, max_input_length=128 (no-pad fast path)
    for k, (B, L) in zip((k0, k1), ((2, 8), (2, 128))):
        input_ids, attention_mask = _make_inputs(k, B, L)
        out = text_encode_forward(input_ids, attention_mask)
        jax.block_until_ready(out)

        ref_labels = jnp.where(attention_mask == 0, -100, input_ids)
        assert jnp.array_equal(out["labels"], ref_labels)
        assert jnp.array_equal(out["decoder_attention_mask"], attention_mask)
        assert jnp.array_equal(out["input_ids"], input_ids)
        assert out["labels"].dtype == input_ids.dtype
        assert out["labels"].shape == (B, L)

    print("KERNEL_OK")
</pallas_src>

<mosaic_0001>
module attributes {stable_mosaic.version = 11 : i64} {
  func.func @_label_kernel(%arg0: i32, %arg1: memref<1x128xi32, #tpu.memory_space<vmem>>, %arg2: memref<1x128xi32, #tpu.memory_space<vmem>>, %arg3: memref<1x128xi32, #tpu.memory_space<vmem>>) attributes {dimension_semantics = [#tpu.dimension_semantics<parallel>], iteration_bounds = array<i64: 1>, scalar_prefetch = 0 : i64, scratch_operands = 0 : i64, tpu.core_type = #tpu.core_type<tc>, window_params = [{transform_indices = @transform_0, window_bounds = array<i64: 1, 128>}, {transform_indices = @transform_1, window_bounds = array<i64: 1, 128>}, {transform_indices = @transform_2, window_bounds = array<i64: 1, 128>}]} {
    %c0 = arith.constant 0 : index
    %c0_0 = arith.constant 0 : index
    %0 = vector.load %arg2[%c0, %c0_0] : memref<1x128xi32, #tpu.memory_space<vmem>>, vector<1x128xi32>
    %c0_i32 = arith.constant 0 : i32
    %1 = vector.broadcast %c0_i32 : i32 to vector<1x128xi32>
    %2 = arith.cmpi eq, %0, %1 : vector<1x128xi32>
    %c0_1 = arith.constant 0 : index
    %c0_2 = arith.constant 0 : index
    %3 = vector.load %arg1[%c0_1, %c0_2] : memref<1x128xi32, #tpu.memory_space<vmem>>, vector<1x128xi32>
    %c-100_i32 = arith.constant -100 : i32
    %4 = vector.broadcast %c-100_i32 : i32 to vector<1x128xi32>
    %5 = arith.select %2, %4, %3 : vector<1x128xi1>, vector<1x128xi32>
    %c0_3 = arith.constant 0 : index
    %c0_4 = arith.constant 0 : index
    %6 = vector.load %arg3[%c0_3, %c0_4] : memref<1x128xi32, #tpu.memory_space<vmem>>, vector<1x128xi32>
    tpu.vector_store %arg3[%c0_3, %c0_4], %5 {strides = array<i32>} : memref<1x128xi32, #tpu.memory_space<vmem>>, vector<1x128xi32>,
    return
  }
  func.func @transform_0(%arg0: i32) -> (i32, i32) {
    %c0_i32 = arith.constant 0 : i32
    %c0_i32_0 = arith.constant 0 : i32
    return %arg0, %c0_i32 : i32, i32
  }
  func.func @transform_1(%arg0: i32) -> (i32, i32) {
    %c0_i32 = arith.constant 0 : i32
    %c0_i32_0 = arith.constant 0 : i32
    return %arg0, %c0_i32 : i32, i32
  }
  func.func @transform_2(%arg0: i32) -> (i32, i32) {
    %c0_i32 = arith.constant 0 : i32
    %c0_i32_0 = arith.constant 0 : i32
    return %arg0, %c0_i32 : i32, i32
  }
}

</mosaic_0001>

<bundles_post_ra>
// kernel: text_encode_forward.1
= control target key start
LH: loop header
LB: loop body
LE: loop exit
PB: predicated region body
PF: predicated region fallthrough
CT: control target
= control target key end

     0   :  { %s44_s0 = inlined_call_operand.vmem [shape: s32[1,128], index: 0, kind: input, shape index: {}]   ;;  %s45_s1 = inlined_call_operand.vmem [shape: s32[1,128], index: 1, kind: input, shape index: {}]   ;;  %s46_s2 = inlined_call_operand.vmem [shape: s32[1,128], index: 2, kind: output, shape index: {}]  }
   0x1   :  { %v11_v0 = vld [vmem:[%s45_s1] sm:$0x1] }
   0x2   :  { %v13_v1 = vld [vmem:[%s44_s0] sm:$0x1]  ;;  %vm12_vm0 = vcmp.eq.s32.totalorder %v11_v0, 0 }
   0x3   :  { %v14_v2 = vsel %vm12_vm0, 4294967196, %v13_v1 }
   0x4   :  { %15 = vst [vmem:[%s46_s2] sm:$0x1] %v14_v2 }

</bundles_post_ra>
